<compile_context>
chip_gen: v5e
topology: v5e:2x2
jax: 0.10.0
libtpu: 0.0.40
codegen_flags: <defaults>
</compile_context>

<pallas_src>
import jax
import jax.numpy as jnp
from jax.experimental import pallas as pl
from jax.experimental.pallas import tpu as pltpu


# ----------------------------------------------------------------------------
# helpers
# ----------------------------------------------------------------------------
def _round_up(x, m):
    return ((x + m - 1) // m) * m


def _pick_tile(dim, cap, align):
    """Largest multiple of `align` that divides `dim` and is <= cap.

    `dim` is already a multiple of `align`, so `align` is always a valid
    fallback. Keeping tiles as exact divisors avoids a second level of
    padding beyond the (8,128) alignment pad.
    """
    cap = max(align, (cap // align) * align)
    best = align
    t = align
    limit = min(cap, dim)
    while t <= limit:
        if dim % t == 0:
            best = t
        t += align
    return best


def _tpu_generation():
    try:
        kind = jax.devices()[0].device_kind.lower()
    except Exception:
        return None
    for g in ("v7", "v6", "v5", "v4", "v3", "v2"):
        if g in kind:
            return g
    return None


def _vmem_limit_bytes(gen):
    if gen == "v7":
        return 40 * 1024 * 1024   # 64 MiB physical per TC -> leave headroom
    if gen in ("v5", "v6"):
        return 64 * 1024 * 1024   # 128 MiB physical, plenty of headroom
    return None                   # unknown / older: keep compiler default


def _tile_caps(gen):
    # (tm_cap, tn_cap, tk_cap) -- worst-case double-buffered footprint with
    # these caps is ~19 MiB f32, safely under every generation's budget.
    if gen == "v7":
        return 512, 512, 1024
    return 512, 512, 2048


# ----------------------------------------------------------------------------
# kernels
# ----------------------------------------------------------------------------
def _gate_kernel_acc(x_ref, w_ref, b_ref, o_ref, acc_ref):
    # x_ref: [tm, tk]   w_ref: [tk, tn] (pre-transposed [IN, OUT] layout)
    # b_ref: [1, tn]    o_ref: [tm, tn]   acc_ref: [tm, tn] f32 scratch
    k = pl.program_id(2)

    @pl.when(k == 0)
    def _():
        acc_ref[...] = jnp.zeros_like(acc_ref)

    acc_ref[...] += jnp.dot(
        x_ref[...], w_ref[...], preferred_element_type=jnp.float32
    )

    @pl.when(k == pl.num_programs(2) - 1)
    def _():
        o_ref[...] = (
            acc_ref[...] + b_ref[...].astype(jnp.float32)
        ).astype(o_ref.dtype)


def _gate_kernel_single(x_ref, w_ref, b_ref, o_ref):
    # Whole reduction fits one K tile: no scratch, no pl.when.
    o_ref[...] = (
        jnp.dot(x_ref[...], w_ref[...], preferred_element_type=jnp.float32)
        + b_ref[...].astype(jnp.float32)
    ).astype(o_ref.dtype)


# ----------------------------------------------------------------------------
# parameter prep (one time, at load) + forward
# ----------------------------------------------------------------------------
def prepare_gate_params(weight, bias, *, compute_dtype=None):
    """One-time prep of nn.Linear params.

    Transposes the PyTorch-layout weight [OUT, IN] to [IN, OUT] and pads both
    dims to multiples of 128 (bias to [1, N_pad]) so the per-call kernel never
    transposes or re-pads W/b (no extra HBM pass over parameters per forward).
    `compute_dtype=jnp.bfloat16` halves W HBM traffic; the kernel still
    accumulates in f32.
    """
    OUT, IN = weight.shape
    assert bias.shape == (OUT,)
    K_pad = _round_up(IN, 128)
    N_pad = _round_up(OUT, 128)

    w_t = weight.T
    if compute_dtype is not None:
        w_t = w_t.astype(compute_dtype)
    if (K_pad, N_pad) != (IN, OUT):
        w_t = jnp.pad(w_t, ((0, K_pad - IN), (0, N_pad - OUT)))

    if N_pad != OUT:
        b_row = jnp.pad(bias, (0, N_pad - OUT)).reshape(1, N_pad)
    else:
        b_row = bias.reshape(1, N_pad)
    return w_t, b_row


def gate_net_forward(x, w_t, b_row, out_features, *, use_pallas=None,
                     tiny_work_threshold=1 << 15):
    """y = x @ W^T + b with W pre-transposed/padded by prepare_gate_params.

    x:            [B, IN]
    w_t:          [K_pad, N_pad]  (= padded [IN, OUT])
    b_row:        [1, N_pad]
    out_features: logical OUT (static int)
    """
    B, IN = x.shape
    K_pad, N_pad = w_t.shape
    assert IN <= K_pad and out_features <= N_pad

    if use_pallas is None:
        # Tiny gates are launch/DMA-setup bound: let XLA fuse the GEMV.
        use_pallas = (B * IN * out_features) > tiny_work_threshold
    if not use_pallas:
        y = jnp.dot(x, w_t[:IN, :out_features]) + b_row[0, :out_features]
        return y.astype(x.dtype)

    gen = _tpu_generation()
    tm_cap, tn_cap, tk_cap = _tile_caps(gen)

    M = _round_up(B, 8)
    tm = _pick_tile(M, tm_cap, 8)
    tn = _pick_tile(N_pad, tn_cap, 128)
    tk = _pick_tile(K_pad, tk_cap, 128)

    # v7x has 2 TensorCores per chip: make sure at least one 'parallel' axis
    # has >= 2 blocks so both cores get work on this mostly mem-bound layer.
    if gen == "v7" and (M // tm) == 1 and (N_pad // tn) == 1 and M >= 16:
        tm = _pick_tile(M, max(tm // 2, 8), 8)

    # x is padded only for (8,128) alignment (W/b were padded once at prep).
    if M != B or K_pad != IN:
        x_p = jnp.pad(x, ((0, M - B), (0, K_pad - IN)))
    else:
        x_p = x

    out_dtype = x.dtype
    bytes_accessed = int(
        x_p.size * x_p.dtype.itemsize
        + w_t.size * w_t.dtype.itemsize
        + b_row.size * b_row.dtype.itemsize
        + M * N_pad * jnp.dtype(out_dtype).itemsize
    )
    cost = pl.CostEstimate(
        flops=2 * M * N_pad * K_pad, transcendentals=0,
        bytes_accessed=bytes_accessed,
    )

    single_k = (K_pad // tk) == 1

    compiler_params = pltpu.CompilerParams(
        dimension_semantics=(
            ("parallel", "parallel") if single_k
            else ("parallel", "parallel", "arbitrary")
        ),
        vmem_limit_bytes=_vmem_limit_bytes(gen),
    )

    if single_k:
        grid = (M // tm, N_pad // tn)
        out = pl.pallas_call(
            _gate_kernel_single,
            out_shape=jax.ShapeDtypeStruct((M, N_pad), out_dtype),
            grid_spec=pltpu.PrefetchScalarGridSpec(
                num_scalar_prefetch=0,
                grid=grid,
                in_specs=[
                    pl.BlockSpec((tm, tk), lambda i, j: (i, 0)),   # x tile
                    pl.BlockSpec((tk, tn), lambda i, j: (0, j)),   # W^T tile
                    pl.BlockSpec((1, tn), lambda i, j: (0, j)),    # bias tile
                ],
                out_specs=pl.BlockSpec((tm, tn), lambda i, j: (i, j)),
            ),
            compiler_params=compiler_params,
            cost_estimate=cost,
        )(x_p, w_t, b_row)
    else:
        grid = (M // tm, N_pad // tn, K_pad // tk)
        out = pl.pallas_call(
            _gate_kernel_acc,
            out_shape=jax.ShapeDtypeStruct((M, N_pad), out_dtype),
            grid_spec=pltpu.PrefetchScalarGridSpec(
                num_scalar_prefetch=0,
                grid=grid,
                in_specs=[
                    pl.BlockSpec((tm, tk), lambda i, j, k: (i, k)),  # x tile
                    pl.BlockSpec((tk, tn), lambda i, j, k: (k, j)),  # W^T tile
                    pl.BlockSpec((1, tn), lambda i, j, k: (0, j)),   # bias tile
                ],
                out_specs=pl.BlockSpec((tm, tn), lambda i, j, k: (i, j)),
                scratch_shapes=[pltpu.VMEM((tm, tn), jnp.float32)],
            ),
            compiler_params=compiler_params,
            cost_estimate=cost,
        )(x_p, w_t, b_row)

    if M != B or N_pad != out_features:
        out = out[:B, :out_features]
    return out
    # TODO(synk): if xprof shows exposed DMA on the K-streamed operands at very
    # large IN, add pipeline_mode=pl.Buffered(3) to the x/W in_specs.


def init_gate_net_params(key, input_shape, output_shape, dtype=jnp.float32):
    """Deterministic init mirroring nn.Linear defaults (uniform +/- 1/sqrt(fan_in))."""
    k_w, k_b = jax.random.split(key)
    bound = 1.0 / (input_shape ** 0.5)
    weight = jax.random.uniform(
        k_w, (output_shape, input_shape), dtype, minval=-bound, maxval=bound
    )
    bias = jax.random.uniform(
        k_b, (output_shape,), dtype, minval=-bound, maxval=bound
    )
    return weight, bias


if __name__ == "__main__":
    key = jax.random.PRNGKey(0)
    k_x, k_p, k_x2, k_p2 = jax.random.split(key, 4)

    # --- shape that exercises the Pallas path (forced) ---------------------
    batch, in_features, out_features = 16, 128, 64
    x = jax.random.normal(k_x, (batch, in_features), jnp.float32)
    weight, bias = init_gate_net_params(k_p, in_features, out_features)
    w_t, b_row = prepare_gate_params(weight, bias)

    fwd = jax.jit(
        lambda x, w, b: gate_net_forward(x, w, b, out_features, use_pallas=True)
    )
    out = jax.block_until_ready(fwd(x, w_t, b_row))

    ref = jnp.dot(x, weight.T, precision=jax.lax.Precision.HIGHEST) + bias
    assert out.shape == (batch, out_features)
    assert jnp.allclose(out, ref, atol=1e-4, rtol=1e-4)

    # --- tiny gate shape: auto-fallback to plain XLA (launch-bound) --------
    b2, i2, o2 = 8, 32, 16
    x2 = jax.random.normal(k_x2, (b2, i2), jnp.float32)
    w2, bias2 = init_gate_net_params(k_p2, i2, o2)
    w2_t, b2_row = prepare_gate_params(w2, bias2)
    fwd2 = jax.jit(lambda x, w, b: gate_net_forward(x, w, b, o2))
    out2 = jax.block_until_ready(fwd2(x2, w2_t, b2_row))
    ref2 = jnp.dot(x2, w2.T, precision=jax.lax.Precision.HIGHEST) + bias2
    assert out2.shape == (b2, o2)
    assert jnp.allclose(out2, ref2, atol=1e-4, rtol=1e-4)

    print("KERNEL_OK")
</pallas_src>

<mosaic_0001>
module attributes {stable_mosaic.version = 11 : i64} {
  func.func @_gate_kernel_single(%arg0: i32, %arg1: i32, %arg2: memref<16x128xf32, #tpu.memory_space<vmem>>, %arg3: memref<128x128xf32, #tpu.memory_space<vmem>>, %arg4: memref<1x128xf32, #tpu.memory_space<vmem>>, %arg5: memref<16x128xf32, #tpu.memory_space<vmem>>) attributes {dimension_semantics = [#tpu.dimension_semantics<parallel>, #tpu.dimension_semantics<parallel>], iteration_bounds = array<i64: 1, 1>, scalar_prefetch = 0 : i64, scratch_operands = 0 : i64, tpu.core_type = #tpu.core_type<tc>, window_params = [{transform_indices = @transform_0, window_bounds = array<i64: 16, 128>}, {transform_indices = @transform_1, window_bounds = array<i64: 128, 128>}, {transform_indices = @transform_2, window_bounds = array<i64: 1, 128>}, {transform_indices = @transform_3, window_bounds = array<i64: 16, 128>}]} {
    %c0 = arith.constant 0 : index
    %c0_0 = arith.constant 0 : index
    %0 = vector.load %arg2[%c0, %c0_0] : memref<16x128xf32, #tpu.memory_space<vmem>>, vector<16x128xf32>
    %c0_1 = arith.constant 0 : index
    %c0_2 = arith.constant 0 : index
    %1 = vector.load %arg3[%c0_1, %c0_2] : memref<128x128xf32, #tpu.memory_space<vmem>>, vector<128x128xf32>
    %cst = arith.constant dense<0.000000e+00> : vector<16x128xf32>
    %2 = tpu.matmul %0, %1, %cst {dimension_numbers = #tpu.dot_dimension_numbers<[1], [0], [0], [1], [0, 0, 1, 1], [], []>} : vector<16x128xf32>, vector<128x128xf32>, vector<16x128xf32> -> vector<16x128xf32>
    %c0_3 = arith.constant 0 : index
    %c0_4 = arith.constant 0 : index
    %3 = vector.load %arg4[%c0_3, %c0_4] : memref<1x128xf32, #tpu.memory_space<vmem>>, vector<1x128xf32>
    %4 = vector.broadcast %3 : vector<1x128xf32> to vector<16x128xf32>
    %5 = arith.addf %2, %4 : vector<16x128xf32>
    %c0_5 = arith.constant 0 : index
    %c0_6 = arith.constant 0 : index
    %6 = vector.load %arg5[%c0_5, %c0_6] : memref<16x128xf32, #tpu.memory_space<vmem>>, vector<16x128xf32>
    tpu.vector_store %arg5[%c0_5, %c0_6], %5 {strides = array<i32>} : memref<16x128xf32, #tpu.memory_space<vmem>>, vector<16x128xf32>,
    return
  }
  func.func @transform_0(%arg0: i32, %arg1: i32) -> (i32, i32) {
    %c0_i32 = arith.constant 0 : i32
    %c0_i32_0 = arith.constant 0 : i32
    return %arg0, %c0_i32 : i32, i32
  }
  func.func @transform_1(%arg0: i32, %arg1: i32) -> (i32, i32) {
    %c0_i32 = arith.constant 0 : i32
    %c0_i32_0 = arith.constant 0 : i32
    return %c0_i32, %arg1 : i32, i32
  }
  func.func @transform_2(%arg0: i32, %arg1: i32) -> (i32, i32) {
    %c0_i32 = arith.constant 0 : i32
    %c0_i32_0 = arith.constant 0 : i32
    return %c0_i32, %arg1 : i32, i32
  }
  func.func @transform_3(%arg0: i32, %arg1: i32) -> (i32, i32) {
    %c0_i32 = arith.constant 0 : i32
    return %arg0, %arg1 : i32, i32
  }
}

</mosaic_0001>

<bundles_post_ra>
// kernel: _lambda_.1
= control target key start
LH: loop header
LB: loop body
LE: loop exit
PB: predicated region body
PF: predicated region fallthrough
CT: control target
= control target key end

     0   :  { %8 = vsyncpa [#allocation3], 0  ;;  %s260_s0 = inlined_call_operand.hbm [shape: f32[16,128], index: 0, kind: input, shape index: {}]   ;;  %s261_s1 = inlined_call_operand.hbm [shape: f32[128,128], index: 1, kind: input, shape index: {}]   ;;  %s262_s2 = inlined_call_operand.vmem [shape: f32[1,128], index: 2, kind: input, shape index: {}]   ;;  %s263_s3 = inlined_call_operand.hbm [shape: f32[16,128], index: 3, kind: output, shape index: {}]  }
   0x1   :  { %9 = vsyncpa [#allocation6], 0 }
   0x2   :  { %10 = vsyncpa [#allocation4], 0  ;;  %s15_s14 = sshll.u32 %s260_s0, 4  ;;  %s214_s15 = smov [#allocation2]   ;;  %s16_s14 = int_to_ptr.hbm [resolvable:$true] %s15_s14 }
   0x3   :  { %s17_s16 = sshll.u32 %s214_s15, 4  ;;  %s28_s19 = sshll.u32 %s261_s1, 4  ;;  %s18_s16 = int_to_ptr.vmem [resolvable:$true] %s17_s16  ;;  %s29_s19 = int_to_ptr.hbm [resolvable:$true] %s28_s19 }
   0x4   :  { %s215_s20 = smov 128   ;;  %s216_s21 = smov 8  }
   0x5   :  { %23 = dma.hbm_to_vmem [thread:$0]  %s16_s14, 256, %s18_s16, [#allocation3], %s215_s20, %s215_s20, %s216_s21  }
   0x6   :  { %s217_s22 = smov [#allocation5]  }
   0x7   :  { %s30_s23 = sshll.u32 %s217_s22, 4  ;;  %s31_s23 = int_to_ptr.vmem [resolvable:$true] %s30_s23 }
   0x8   :  { %36 = dma.hbm_to_vmem [thread:$0]  %s29_s19, 2048, %s31_s23, [#allocation6], %s215_s20, %s215_s20, %s216_s21  }
   0x9   :  { %208 = dma.done.wait [#allocation3], 256  }
   0xa   :  { %209 = vsyncadd [#allocation3], 4294967040 }
   0xb   :  { %210 = dma.done.wait [#allocation6], 2048  }
   0xc   :  { %211 = vsyncadd [#allocation6], 4294965248  ;;  %v64_v0 = vld [vmem:[#allocation5 + $0x78] sm:$0xff]  ;;  %v63_v1 = vld [vmem:[#allocation5 + $0x70] sm:$0xff]  ;;  %s218_s24 = smov [#allocation7]   ;;  %s100_s28 = sshll.u32 %s263_s3, 4  ;;  %s101_s28 = int_to_ptr.hbm [resolvable:$true] %s100_s28 }
   0xd   :  { %69 = vmatpush.msra.mxu0 %v64_v0  ;;  %114 = vmatpush.msra.mxu1 %v64_v0  ;;  %v62_v2 = vld [vmem:[#allocation5 + $0x68] sm:$0xff]  ;;  %v61_v3 = vld [vmem:[#allocation5 + $0x60] sm:$0xff]  ;;  %v60_v4 = vld [vmem:[#allocation5 + $0x58] sm:$0xff]  ;;  %s98_s25 = sshll.u32 %s218_s24, 4  ;;  %s99_s25 = int_to_ptr.vmem [resolvable:$true] %s98_s25 }
   0xe   :  { %v59_v5 = vld [vmem:[#allocation5 + $0x50] sm:$0xff]  ;;  %v58_v6 = vld [vmem:[#allocation5 + $0x48] sm:$0xff]  ;;  %v57_v7 = vld [vmem:[#allocation5 + $0x40] sm:$0xff] }
   0xf   :  { %70 = vmatpush.msra.mxu0 %v63_v1  ;;  %115 = vmatpush.msra.mxu1 %v63_v1  ;;  %v56_v8 = vld [vmem:[#allocation5 + $0x38] sm:$0xff]  ;;  %v55_v9 = vld [vmem:[#allocation5 + $0x30] sm:$0xff]  ;;  %v54_v10 = vld [vmem:[#allocation5 + $0x28] sm:$0xff] }
  0x10   :  { %v53_v11 = vld [vmem:[#allocation5 + $0x20] sm:$0xff]  ;;  %v52_v12 = vld [vmem:[#allocation5 + $0x18] sm:$0xff]  ;;  %v51_v13 = vld [vmem:[#allocation5 + $0x10] sm:$0xff] }
  0x11   :  { %71 = vmatpush.msra.mxu0 %v62_v2  ;;  %116 = vmatpush.msra.mxu1 %v62_v2  ;;  %v50_v14 = vld [vmem:[#allocation5 + $0x8] sm:$0xff]  ;;  %v49_v15 = vld [vmem:[#allocation5] sm:$0xff]  ;;  %v47_v16 = vld [vmem:[#allocation2] sm:$0xff] }
  0x12   :  { %v48_v17 = vld [vmem:[#allocation2 + $0x8] sm:$0xff]  ;;  %v135_v18 = vld [vmem:[%s262_s2] ss:$0 sm:$0xff] }
  0x13   :  { %72 = vmatpush.msra.mxu0 %v61_v3  ;;  %117 = vmatpush.msra.mxu1 %v61_v3 }
  0x15   :  { %73 = vmatpush.msra.mxu0 %v60_v4  ;;  %118 = vmatpush.msra.mxu1 %v60_v4 }
  0x17   :  { %74 = vmatpush.msra.mxu0 %v59_v5  ;;  %119 = vmatpush.msra.mxu1 %v59_v5 }
  0x19   :  { %75 = vmatpush.msra.mxu0 %v58_v6  ;;  %120 = vmatpush.msra.mxu1 %v58_v6 }
  0x1b   :  { %76 = vmatpush.msra.mxu0 %v57_v7  ;;  %121 = vmatpush.msra.mxu1 %v57_v7 }
  0x1d   :  { %77 = vmatpush.msra.mxu0 %v56_v8  ;;  %122 = vmatpush.msra.mxu1 %v56_v8 }
  0x1f   :  { %78 = vmatpush.msra.mxu0 %v55_v9  ;;  %123 = vmatpush.msra.mxu1 %v55_v9 }
  0x21   :  { %79 = vmatpush.msra.mxu0 %v54_v10  ;;  %124 = vmatpush.msra.mxu1 %v54_v10 }
  0x23   :  { %80 = vmatpush.msra.mxu0 %v53_v11  ;;  %125 = vmatpush.msra.mxu1 %v53_v11 }
  0x25   :  { %81 = vmatpush.msra.mxu0 %v52_v12  ;;  %126 = vmatpush.msra.mxu1 %v52_v12 }
  0x27   :  { %82 = vmatpush.msra.mxu0 %v51_v13  ;;  %127 = vmatpush.msra.mxu1 %v51_v13 }
  0x29   :  { %83 = vmatpush.msra.mxu0 %v50_v14  ;;  %128 = vmatpush.msra.mxu1 %v50_v14 }
  0x2b   :  { %84 = vmatpush.msra.mxu0 %v49_v15  ;;  %129 = vmatpush.msra.mxu1 %v49_v15 }
  0x2c   :  { %85 = vmatmul.f32.vlgmr.msra.gmra.mxu0 %v47_v16  ;;  %88 = vmatmul.f32.vlgmr.msra.gmra.mxu1 %v48_v17 }
  0xa9   :  { %v86_v19 = vpop.f32.mrf.mxu0  ;;  %v89_v20 = vpop.f32.mrf.mxu1 }
  0xaa   :  { %v87_v21 = vadd.f32 %v135_v18, %v86_v19  ;;  %v90_v22 = vadd.f32 %v135_v18, %v89_v20 }
  0xac   :  { %92 = vst [vmem:[#allocation7] sm:$0xff] %v87_v21 }
  0xad   :  { %93 = vst [vmem:[#allocation7 + $0x8] sm:$0xff] %v90_v22 }
  0xae   :  { %106 = dma.vmem_to_hbm [thread:$0]  %s99_s25, 256, %s101_s28, [#allocation4], %s215_s20, %s215_s20, %s216_s21  }
  0xaf   :  { %212 = dma.done.wait [#allocation4], 256  }
  0xb0   :  { %213 = vsyncadd [#allocation4], 4294967040 }
  0xb1   :  { %111 = vsyncpa [#allocation3], 1 }
  0xb2   :  { %112 = vsyncpa [#allocation6], 1 }
  0xb3   :  { %113 = vsyncpa [#allocation4], 1 }

</bundles_post_ra>
